<compile_context>
chip_gen: v6e
topology: v6e:2x2x1
jax: 0.10.0
libtpu: 0.0.40
codegen_flags: <defaults>
</compile_context>

<pallas_src>
import math

import jax
import jax.numpy as jnp
from jax.experimental import pallas as pl
from jax.experimental.pallas import tpu as pltpu


_SQRT_HALF = 1.0 / math.sqrt(2.0)


def _erf(x):
    """Abramowitz & Stegun 7.1.26 erf approximation (max abs err ~1.5e-7).

    Built only from ops with guaranteed Mosaic lowerings (exp, mul, add,
    reciprocal, where).  The reciprocal uses the EUP approx path.
    """
    a1, a2, a3, a4, a5 = (0.254829592, -0.284496736, 1.421413741,
                          -1.453152027, 1.061405429)
    p = 0.3275911
    sign = jnp.where(x >= 0.0, 1.0, -1.0)
    ax = jnp.abs(x)
    # EUP reciprocal (approx) instead of a VALU divide.
    t = pl.reciprocal(1.0 + p * ax, approx=True)
    poly = ((((a5 * t + a4) * t + a3) * t + a2) * t + a1) * t
    y = 1.0 - poly * jnp.exp(-ax * ax)
    return sign * y


def _gelu_exact(x):
    # nn.GELU() default (approximate='none'): x * 0.5 * (1 + erf(x / sqrt(2)))
    return 0.5 * x * (1.0 + _erf(x * _SQRT_HALF))


def _mlp_kernel(x_ref, w_fc_ref, b_fc_ref, w_pr_ref, b_pr_ref, o_ref):
    """One grid step processes a (tm, C) row tile of the flattened input."""
    x = x_ref[...]
    if x.dtype != jnp.bfloat16:
        x = x.astype(jnp.bfloat16)               # bf16 MXU operands, f32 acc
    h = jnp.dot(x, w_fc_ref[...], preferred_element_type=jnp.float32)
    h = h + b_fc_ref[...].astype(jnp.float32)    # (tm, 4C), f32
    h = _gelu_exact(h)                           # f32 elementwise (v5e-safe)
    out = jnp.dot(h.astype(jnp.bfloat16), w_pr_ref[...],
                  preferred_element_type=jnp.float32)
    out = out + b_pr_ref[...].astype(jnp.float32)  # (tm, C)
    # TODO(synk): dropout is identity here (eval mode); training would need
    # pltpu.prng_seed / prng_random_bits masking.
    o_ref[...] = out.astype(o_ref.dtype)


def _pick_row_tile(M):
    """Single grid step for small M; up to 512-row tiles for large M.

    Only splits rows when each tile keeps >= 128 rows, so megacore sharding /
    pipelining is used only where it pays for the per-step overhead.
    """
    if M <= 512:
        return M  # full-extent block: always a legal block shape
    for t in (512, 256, 128):
        if M % t == 0:
            return t
    # No nice divisor: fall back to the full extent (legal, single step).
    return M


def _compiler_params(tm, C, H, x_itemsize):
    """Bump scoped VMEM only when the resident footprint needs it (v7x)."""
    bytes_io = 2 * 2 * tm * C * x_itemsize          # double-buffered x + out tiles
    bytes_w = 2 * (C * H + H * C) * 2               # bf16 weights (+buffering)
    bytes_b = 2 * (H + C) * 4
    bytes_h = 2 * tm * H * 4                        # f32 hidden intermediates
    est = bytes_io + bytes_w + bytes_b + bytes_h
    default_scoped = 32 * 1024 * 1024
    if 2 * est > default_scoped:
        return pltpu.CompilerParams(
            dimension_semantics=("parallel",),
            vmem_limit_bytes=min(2 * est, 96 * 1024 * 1024))
    return pltpu.CompilerParams(dimension_semantics=("parallel",))


def mlp_forward(x, w_fc, b_fc, w_proj, b_proj):
    """x: (B, T, C). w_fc: (C, 4C), b_fc: (4C,), w_proj: (4C, C), b_proj: (C,)."""
    B, T, C = x.shape
    H = w_fc.shape[1]
    M = B * T

    x2 = x.reshape(M, C)                 # fuse batch + seq into the matmul M dim
    w_fc_b = w_fc.astype(jnp.bfloat16)   # bf16 MXU operands, halve weight bytes
    w_pr_b = w_proj.astype(jnp.bfloat16)
    b_fc2 = b_fc.reshape(1, H).astype(jnp.float32)
    b_pr2 = b_proj.reshape(1, C).astype(jnp.float32)

    tm = _pick_row_tile(M)
    grid = (M // tm,)

    out2 = pl.pallas_call(
        _mlp_kernel,
        out_shape=jax.ShapeDtypeStruct((M, C), x.dtype),
        grid_spec=pltpu.PrefetchScalarGridSpec(
            num_scalar_prefetch=0,
            grid=grid,
            in_specs=[
                pl.BlockSpec((tm, C), lambda i: (i, 0)),   # x row tile
                pl.BlockSpec((C, H), lambda i: (0, 0)),    # W_fc   (resident, bf16)
                pl.BlockSpec((1, H), lambda i: (0, 0)),    # b_fc   (resident, f32)
                pl.BlockSpec((H, C), lambda i: (0, 0)),    # W_proj (resident, bf16)
                pl.BlockSpec((1, C), lambda i: (0, 0)),    # b_proj (resident, f32)
            ],
            out_specs=pl.BlockSpec((tm, C), lambda i: (i, 0)),
        ),
        compiler_params=_compiler_params(tm, C, H, x.dtype.itemsize),
    )(x2, w_fc_b, b_fc2, w_pr_b, b_pr2)

    return out2.reshape(B, T, C)


def _reference(x, w_fc, b_fc, w_proj, b_proj):
    """Plain-JAX f32 reference mirroring the PyTorch forward (dropout=0, exact GELU)."""
    h = x @ w_fc + b_fc
    h = 0.5 * h * (1.0 + jax.scipy.special.erf(h * _SQRT_HALF))
    return h @ w_proj + b_proj


if __name__ == "__main__":
    # config: n_embd=32 (hidden = 4*32 = 128), dropout=0, batch=2, seq=8
    B, T, C = 2, 8, 32
    H = 4 * C

    key = jax.random.PRNGKey(0)
    kx, kw1, kb1, kw2, kb2 = jax.random.split(key, 5)

    x = jax.random.normal(kx, (B, T, C), dtype=jnp.float32)
    # deterministic synthetic parameters (not a checkpoint)
    w_fc = jax.random.normal(kw1, (C, H), dtype=jnp.float32) * 0.05
    b_fc = jax.random.normal(kb1, (H,), dtype=jnp.float32) * 0.05
    w_proj = jax.random.normal(kw2, (H, C), dtype=jnp.float32) * 0.05
    b_proj = jax.random.normal(kb2, (C,), dtype=jnp.float32) * 0.05

    out = mlp_forward(x, w_fc, b_fc, w_proj, b_proj)
    out = jax.block_until_ready(out)

    ref = _reference(x, w_fc, b_fc, w_proj, b_proj)
    assert out.shape == (B, T, C)
    # Tolerance relaxed vs the previous f32 version: matmul operands are bf16
    # (f32 accumulation) and the erf reciprocal uses the EUP approx path.
    assert jnp.allclose(out, ref, atol=2e-2, rtol=2e-2), "mismatch vs reference"

    print("KERNEL_OK")
</pallas_src>

<mosaic_0001>
module attributes {stable_mosaic.version = 11 : i64} {
  func.func @_mlp_kernel(%arg0: i32, %arg1: memref<16x32xf32, #tpu.memory_space<vmem>>, %arg2: memref<32x128xbf16, #tpu.memory_space<vmem>>, %arg3: memref<1x128xf32, #tpu.memory_space<vmem>>, %arg4: memref<128x32xbf16, #tpu.memory_space<vmem>>, %arg5: memref<1x32xf32, #tpu.memory_space<vmem>>, %arg6: memref<16x32xf32, #tpu.memory_space<vmem>>) attributes {dimension_semantics = [#tpu.dimension_semantics<parallel>], iteration_bounds = array<i64: 1>, scalar_prefetch = 0 : i64, scratch_operands = 0 : i64, tpu.core_type = #tpu.core_type<tc>, window_params = [{transform_indices = @transform_0, window_bounds = array<i64: 16, 32>}, {pipeline_mode = #tpu.pipeline_mode<synchronous>, transform_indices = @transform_1, window_bounds = array<i64: 32, 128>}, {pipeline_mode = #tpu.pipeline_mode<synchronous>, transform_indices = @transform_2, window_bounds = array<i64: 1, 128>}, {pipeline_mode = #tpu.pipeline_mode<synchronous>, transform_indices = @transform_3, window_bounds = array<i64: 128, 32>}, {pipeline_mode = #tpu.pipeline_mode<synchronous>, transform_indices = @transform_4, window_bounds = array<i64: 1, 32>}, {transform_indices = @transform_5, window_bounds = array<i64: 16, 32>}]} {
    %c0 = arith.constant 0 : index
    %c0_0 = arith.constant 0 : index
    %0 = vector.load %arg1[%c0, %c0_0] : memref<16x32xf32, #tpu.memory_space<vmem>>, vector<16x32xf32>
    %1 = arith.truncf %0 : vector<16x32xf32> to vector<16x32xbf16>
    %c0_1 = arith.constant 0 : index
    %c0_2 = arith.constant 0 : index
    %2 = vector.load %arg2[%c0_1, %c0_2] : memref<32x128xbf16, #tpu.memory_space<vmem>>, vector<32x128xbf16>
    %cst = arith.constant dense<0.000000e+00> : vector<16x128xf32>
    %3 = tpu.matmul %1, %2, %cst {dimension_numbers = #tpu.dot_dimension_numbers<[1], [0], [0], [1], [0, 0, 1, 1], [], []>} : vector<16x32xbf16>, vector<32x128xbf16>, vector<16x128xf32> -> vector<16x128xf32>
    %c0_3 = arith.constant 0 : index
    %c0_4 = arith.constant 0 : index
    %4 = vector.load %arg3[%c0_3, %c0_4] : memref<1x128xf32, #tpu.memory_space<vmem>>, vector<1x128xf32>
    %5 = vector.broadcast %4 : vector<1x128xf32> to vector<16x128xf32>
    %6 = arith.addf %3, %5 : vector<16x128xf32>
    %cst_5 = arith.constant 5.000000e-01 : f32
    %7 = vector.broadcast %cst_5 : f32 to vector<16x128xf32>
    %8 = arith.mulf %7, %6 : vector<16x128xf32>
    %cst_6 = arith.constant 0.707106769 : f32
    %9 = vector.broadcast %cst_6 : f32 to vector<16x128xf32>
    %10 = arith.mulf %6, %9 : vector<16x128xf32>
    %cst_7 = arith.constant 0.000000e+00 : f32
    %11 = vector.broadcast %cst_7 : f32 to vector<16x128xf32>
    %12 = arith.cmpf oge, %10, %11 : vector<16x128xf32>
    %cst_8 = arith.constant 1.000000e+00 : f32
    %cst_9 = arith.constant -1.000000e+00 : f32
    %13 = vector.broadcast %cst_8 : f32 to vector<16x128xf32>
    %14 = vector.broadcast %cst_9 : f32 to vector<16x128xf32>
    %15 = arith.select %12, %13, %14 : vector<16x128xi1>, vector<16x128xf32>
    %16 = math.absf %10 : vector<16x128xf32>
    %cst_10 = arith.constant 0.327591091 : f32
    %17 = vector.broadcast %cst_10 : f32 to vector<16x128xf32>
    %18 = arith.mulf %17, %16 : vector<16x128xf32>
    %cst_11 = arith.constant 1.000000e+00 : f32
    %19 = vector.broadcast %cst_11 : f32 to vector<16x128xf32>
    %20 = arith.addf %19, %18 : vector<16x128xf32>
    %21 = tpu.reciprocal %20 {approx = true} : vector<16x128xf32> -> vector<16x128xf32>
    %cst_12 = arith.constant 1.06140542 : f32
    %22 = vector.broadcast %cst_12 : f32 to vector<16x128xf32>
    %23 = arith.mulf %22, %21 : vector<16x128xf32>
    %cst_13 = arith.constant -1.45315206 : f32
    %24 = vector.broadcast %cst_13 : f32 to vector<16x128xf32>
    %25 = arith.addf %23, %24 : vector<16x128xf32>
    %26 = arith.mulf %25, %21 : vector<16x128xf32>
    %cst_14 = arith.constant 1.42141378 : f32
    %27 = vector.broadcast %cst_14 : f32 to vector<16x128xf32>
    %28 = arith.addf %26, %27 : vector<16x128xf32>
    %29 = arith.mulf %28, %21 : vector<16x128xf32>
    %cst_15 = arith.constant -0.284496725 : f32
    %30 = vector.broadcast %cst_15 : f32 to vector<16x128xf32>
    %31 = arith.addf %29, %30 : vector<16x128xf32>
    %32 = arith.mulf %31, %21 : vector<16x128xf32>
    %cst_16 = arith.constant 0.254829586 : f32
    %33 = vector.broadcast %cst_16 : f32 to vector<16x128xf32>
    %34 = arith.addf %32, %33 : vector<16x128xf32>
    %35 = arith.mulf %34, %21 : vector<16x128xf32>
    %cst_17 = arith.constant 0.000000e+00 : f32
    %36 = vector.broadcast %cst_17 : f32 to vector<16x128xf32>
    %37 = arith.subf %36, %16 : vector<16x128xf32>
    %38 = arith.mulf %37, %16 : vector<16x128xf32>
    %39 = math.exp %38 : vector<16x128xf32>
    %40 = arith.mulf %35, %39 : vector<16x128xf32>
    %cst_18 = arith.constant 1.000000e+00 : f32
    %41 = vector.broadcast %cst_18 : f32 to vector<16x128xf32>
    %42 = arith.subf %41, %40 : vector<16x128xf32>
    %43 = arith.mulf %15, %42 : vector<16x128xf32>
    %cst_19 = arith.constant 1.000000e+00 : f32
    %44 = vector.broadcast %cst_19 : f32 to vector<16x128xf32>
    %45 = arith.addf %44, %43 : vector<16x128xf32>
    %46 = arith.mulf %8, %45 : vector<16x128xf32>
    %47 = arith.truncf %46 : vector<16x128xf32> to vector<16x128xbf16>
    %c0_20 = arith.constant 0 : index
    %c0_21 = arith.constant 0 : index
    %48 = vector.load %arg4[%c0_20, %c0_21] : memref<128x32xbf16, #tpu.memory_space<vmem>>, vector<128x32xbf16>
    %cst_22 = arith.constant dense<0.000000e+00> : vector<16x32xf32>
    %49 = tpu.matmul %47, %48, %cst_22 {dimension_numbers = #tpu.dot_dimension_numbers<[1], [0], [0], [1], [0, 0, 1, 1], [], []>} : vector<16x128xbf16>, vector<128x32xbf16>, vector<16x32xf32> -> vector<16x32xf32>
    %c0_23 = arith.constant 0 : index
    %c0_24 = arith.constant 0 : index
    %50 = vector.load %arg5[%c0_23, %c0_24] : memref<1x32xf32, #tpu.memory_space<vmem>>, vector<1x32xf32>
    %51 = vector.broadcast %50 : vector<1x32xf32> to vector<16x32xf32>
    %52 = arith.addf %49, %51 : vector<16x32xf32>
    %c0_25 = arith.constant 0 : index
    %c0_26 = arith.constant 0 : index
    %53 = vector.load %arg6[%c0_25, %c0_26] : memref<16x32xf32, #tpu.memory_space<vmem>>, vector<16x32xf32>
    tpu.vector_store %arg6[%c0_25, %c0_26], %52 {strides = array<i32>} : memref<16x32xf32, #tpu.memory_space<vmem>>, vector<16x32xf32>,
    return
  }
  func.func @transform_0(%arg0: i32) -> (i32, i32) {
    %c0_i32 = arith.constant 0 : i32
    %c0_i32_0 = arith.constant 0 : i32
    return %arg0, %c0_i32 : i32, i32
  }
  func.func @transform_1(%arg0: i32) -> (i32, i32) {
    %c0_i32 = arith.constant 0 : i32
    %c0_i32_0 = arith.constant 0 : i32
    %c0_i32_1 = arith.constant 0 : i32
    return %c0_i32, %c0_i32_0 : i32, i32
  }
  func.func @transform_2(%arg0: i32) -> (i32, i32) {
    %c0_i32 = arith.constant 0 : i32
    %c0_i32_0 = arith.constant 0 : i32
    %c0_i32_1 = arith.constant 0 : i32
    return %c0_i32, %c0_i32_0 : i32, i32
  }
  func.func @transform_3(%arg0: i32) -> (i32, i32) {
    %c0_i32 = arith.constant 0 : i32
    %c0_i32_0 = arith.constant 0 : i32
    %c0_i32_1 = arith.constant 0 : i32
    return %c0_i32, %c0_i32_0 : i32, i32
  }
  func.func @transform_4(%arg0: i32) -> (i32, i32) {
    %c0_i32 = arith.constant 0 : i32
    %c0_i32_0 = arith.constant 0 : i32
    %c0_i32_1 = arith.constant 0 : i32
    return %c0_i32, %c0_i32_0 : i32, i32
  }
  func.func @transform_5(%arg0: i32) -> (i32, i32) {
    %c0_i32 = arith.constant 0 : i32
    %c0_i32_0 = arith.constant 0 : i32
    return %arg0, %c0_i32 : i32, i32
  }
}

</mosaic_0001>

<bundles_post_ra>
// kernel: tpu_custom_call.1
= control target key start
LH: loop header
LB: loop body
LE: loop exit
PB: predicated region body
PF: predicated region fallthrough
CT: control target
= control target key end

     0   :  { %v375_v1 = vmov 0.0   ;;  %vm376_vm0 = vmmov 0   ;;  %vm48_vm1 = vcmask 261120   ;;  %s459_s0 = inlined_call_operand.vmem [shape: f32[16,32], index: 0, kind: input, shape index: {}]   ;;  %s460_s1 = inlined_call_operand.vmem [shape: bf16[32,128], index: 1, kind: input, shape index: {}]   ;;  %s461_s2 = inlined_call_operand.vmem [shape: f32[1,128], index: 2, kind: input, shape index: {}]   ;;  %s462_s3 = inlined_call_operand.vmem [shape: bf16[128,32], index: 3, kind: input, shape index: {}]   ;;  %s463_s4 = inlined_call_operand.vmem [shape: f32[1,32], index: 4, kind: input, shape index: {}]   ;;  %s464_s5 = inlined_call_operand.hbm [shape: f32[16,32], index: 5, kind: output, shape index: {}]  }
   0x1   :  { %v335_v0 = vld [vmem:[%s460_s1 + $0x8] sm:$0xff]   ;;  %301 = vmatprep.subr.bf16.mxu0 %v375_v1  ;;  %309 = vmatprep.subr.bf16.mxu1 %v375_v1  ;;  %v336_v2 = vld [vmem:[%s460_s1] sm:$0xff]  }
   0x2   :  { %302 = vmatpush3.bf16.msra.mxu0 %v335_v0  ;;  %305 = vmatprep.mubr.msk.bf16.mxu0 %vm376_vm0, %v375_v1  ;;  %v22_v3 = vld [vmem:[%s459_s0] sm:$0xff]  ;;  %v23_v4 = vld [vmem:[%s459_s0 + $0x8] sm:$0xff] }
   0x3   :  { %303 = vmatprep.subr.bf16.mxu0 %v375_v1  ;;  %325 = vmatprep.mubr.msk.bf16.mxu1 %vm376_vm0, %v375_v1  ;;  %v24_v5 = vpack.c.bf16 %v23_v4, %v22_v3 }
   0x6   :  { %304 = vmatpush3.bf16.msra.mxu0 %v336_v2 }
   0x7   :  { %10 = vsyncpa [#allocation3], 0  ;;  %v337_v6 = vld [vmem:[%s462_s3 + $0x38] sm:$0xff]   ;;  %v338_v7 = vld [vmem:[%s462_s3 + $0x30] sm:$0xff]   ;;  %v377_v59 = vmov -1.0   ;;  %s378_s17 = smov [#allocation2]  }
   0x8   :  { %310 = vmatpush3.bf16.msra.mxu1 %v337_v6  ;;  %v339_v8 = vld [vmem:[%s462_s3 + $0x28] sm:$0xff]   ;;  %v340_v9 = vld [vmem:[%s462_s3 + $0x20] sm:$0xff]   ;;  %v341_v10 = vld [vmem:[%s462_s3 + $0x18] sm:$0xff]   ;;  %s265_s18 = sshll.u32 %s378_s17, 4  ;;  %s266_s18 = int_to_ptr.vmem [resolvable:$true] %s265_s18 }
   0x9   :  { %306 = vmatmul.mubr.msk.bf16.vlgmr.msra.gmra.mxu0 %vm48_vm1, %v24_v5  ;;  %311 = vmatprep.subr.bf16.mxu1 %v375_v1  ;;  %v342_v11 = vld [vmem:[%s462_s3 + $0x10] sm:$0xff]   ;;  %v343_v12 = vld [vmem:[%s462_s3 + $0x8] sm:$0xff]   ;;  %v344_v13 = vld [vmem:[%s462_s3] sm:$0xff]   ;;  %s353_s19 = scalar_lea.vmem %s266_s18, 256  ;;  %p358_p1 = scmp.lt.s32.totalorder %s266_s18, %s266_s18 }
   0xa   :  { %v276_v14 = vld [vmem:[%s461_s2] ss:$0 sm:$0xff]  ;;  %p354_p0 = scmp.ne.s32.totalorder %s266_s18, %s353_s19  ;;  %p359_p2 = scmp.lt.s32.totalorder %s353_s19, %s353_s19 }
   0xc   :  { %312 = vmatpush3.bf16.msra.mxu1 %v338_v7  ;;  %p360_p3 = por %p359_p2, %p358_p1 }
   0xd   :  { %313 = vmatprep.subr.bf16.mxu1 %v375_v1 }
   0xe   :  { %p361_p4 = pnand %p360_p3, %p354_p0 }
  0x10   :  { %314 = vmatpush3.bf16.msra.mxu1 %v339_v8 }
  0x11   :  { %315 = vmatprep.subr.bf16.mxu1 %v375_v1 }
  0x14   :  { %316 = vmatpush3.bf16.msra.mxu1 %v340_v9  ;;  %v280_v9 = vld [vmem:[%s463_s4] ss:$0 sm:$0xff] }
  0x15   :  { %317 = vmatprep.subr.bf16.mxu1 %v375_v1 }
  0x18   :  { %318 = vmatpush3.bf16.msra.mxu1 %v341_v10 }
  0x19   :  { %319 = vmatprep.subr.bf16.mxu1 %v375_v1 }
  0x1c   :  { %320 = vmatpush3.bf16.msra.mxu1 %v342_v11 }
  0x1d   :  { %321 = vmatprep.subr.bf16.mxu1 %v375_v1 }
  0x20   :  { %322 = vmatpush3.bf16.msra.mxu1 %v343_v12 }
  0x21   :  { %323 = vmatprep.subr.bf16.mxu1 %v375_v1 }
  0x24   :  { %324 = vmatpush3.bf16.msra.mxu1 %v344_v13 }
  0xc9   :  { %v86_v15 = vpop.f32.mrf.mxu0 }
  0xca   :  { %v87_v16 = vadd.f32 %v276_v14, %v86_v15 }
  0xcb   :  { %v307_v17 = vpop.f32.mrf.mxu0 }
  0xcc   :  { %v95_v18 = vmul.f32 0.70710677, %v87_v16  ;;  %v93_v3 = vmul.f32 0.5, %v87_v16 }
  0xcd   :  { %v89_v19 = vpop.f32.mrf.mxu0 }
  0xce   :  { %v101_v20 = vand.u32 2147483647, %v95_v18  ;;  %v90_v21 = vadd.f32 %v276_v14, %v89_v19  ;;  %vm97_vm2 = vcmp.ge.f32.partialorder %v95_v18, 0.0 }
  0xcf   :  { %v308_v22 = vpop.f32.mrf.mxu0  ;;  %v99_v60 = vsel %vm97_vm2, 1.0, %v377_v59 }
  0xd0   :  { %v103_v23 = vmul.f32 0.3275911, %v101_v20  ;;  %v96_v24 = vmul.f32 0.70710677, %v90_v21  ;;  %v127_v29 = vsub.f32 0.0, %v101_v20  ;;  %v94_v4 = vmul.f32 0.5, %v90_v21 }
  0xd2   :  { %v105_v25 = vadd.f32 1.0, %v103_v23  ;;  %v102_v26 = vand.u32 2147483647, %v96_v24  ;;  %v129_v30 = vmul.f32 %v127_v29, %v101_v20  ;;  %vm98_vm3 = vcmp.ge.f32.partialorder %v96_v24, 0.0 }
  0xd3   :  { %v100_v0 = vsel %vm98_vm3, 1.0, %v377_v59 }
  0xd4   :  { %345 = vrcp.f32 %v105_v25  ;;  %v104_v27 = vmul.f32 0.3275911, %v102_v26  ;;  %v128_v31 = vsub.f32 0.0, %v102_v26  ;;  %v131_v34 = vmul.f32 1.442695, %v129_v30 }
  0xd6   :  { %v106_v28 = vadd.f32 1.0, %v104_v27  ;;  %v130_v35 = vmul.f32 %v128_v31, %v102_v26 }
  0xd8   :  { %347 = vrcp.f32 %v106_v28  ;;  %v133_v40 = vmul.f32 1.442695, %v130_v35 }
  0xd9   :  { %349 = vpow2.f32 %v131_v34 }
  0xda   :  { %351 = vpow2.f32 %v133_v40 }
  0xe1   :  { %v346_v32 = vpop.eup %345 }
  0xe2   :  { %v109_v33 = vmul.f32 1.0614054, %v346_v32 }
  0xe4   :  { %v111_v36 = vadd.f32 -1.4531521, %v109_v33 }
  0xe5   :  { %v348_v37 = vpop.eup %347 }
  0xe6   :  { %v113_v38 = vmul.f32 %v346_v32, %v111_v36  ;;  %v110_v39 = vmul.f32 1.0614054, %v348_v37  ;;  %v350_v53 = vpop.eup %349 }
  0xe7   :  { %v352_v58 = vpop.eup %351 }
  0xe8   :  { %v115_v41 = vadd.f32 1.4214138, %v113_v38  ;;  %v112_v42 = vadd.f32 -1.4531521, %v110_v39 }
  0xea   :  { %v117_v43 = vmul.f32 %v346_v32, %v115_v41  ;;  %v114_v44 = vmul.f32 %v348_v37, %v112_v42 }
  0xec   :  { %v119_v45 = vadd.f32 -0.28449672, %v117_v43  ;;  %v116_v46 = vadd.f32 1.4214138, %v114_v44 }
  0xee   :  { %v121_v47 = vmul.f32 %v346_v32, %v119_v45  ;;  %v118_v48 = vmul.f32 %v348_v37, %v116_v46 }
  0xf0   :  { %v123_v49 = vadd.f32 0.2548296, %v121_v47  ;;  %v120_v50 = vadd.f32 -0.28449672, %v118_v48 }
  0xf2   :  { %v125_v51 = vmul.f32 %v346_v32, %v123_v49  ;;  %v122_v52 = vmul.f32 %v348_v37, %v120_v50 }
  0xf4   :  { %v135_v54 = vmul.f32 %v350_v53, %v125_v51  ;;  %v124_v55 = vadd.f32 0.2548296, %v122_v52 }
  0xf6   :  { %v137_v56 = vsub.f32 1.0, %v135_v54  ;;  %v126_v57 = vmul.f32 %v348_v37, %v124_v55 }
  0xf8   :  { %v139_v61 = vmul.f32 %v137_v56, %v99_v60  ;;  %v136_v62 = vmul.f32 %v352_v58, %v126_v57 }
  0xfa   :  { %v138_v63 = vsub.f32 1.0, %v136_v62  ;;  %v141_v1 = vadd.f32 1.0, %v139_v61 }
  0xfc   :  { %v140_v2 = vmul.f32 %v138_v63, %v100_v0  ;;  %v143_v6 = vmul.f32 %v141_v1, %v93_v3 }
  0xfe   :  { %v142_v5 = vadd.f32 1.0, %v140_v2 }
 0x100   :  { %v144_v7 = vmul.f32 %v142_v5, %v94_v4 }
 0x102   :  { %v145_v8 = vpack.c.bf16 %v144_v7, %v143_v6 }
 0x104   :  { %326 = vmatmul.mubr.bf16.vlgmr.msra.gmra.mxu1 %v145_v8 }
 0x1c4   :  { %v251_v10 = vpop.f32.mrf.mxu1 }
 0x1c5   :  { %v252_v11 = vadd.f32 %v280_v9, %v251_v10 }
 0x1c6   :  { %v327_v12 = vpop.f32.mrf.mxu1 }
 0x1c7   :  { %258 = vst.msk [vmem:[#allocation2] sm:$0xff] %vm48_vm1, %v252_v11 }
 0x1c8   :  { %v254_v13 = vpop.f32.mrf.mxu1 }
 0x1c9   :  { %v255_v14 = vadd.f32 %v280_v9, %v254_v13 }
 0x1ca   :  { %v328_v15 = vpop.f32.mrf.mxu1 }
 0x1cb   :  { %259 = vst.msk [vmem:[#allocation2 + $0x8] sm:$0xff] %vm48_vm1, %v255_v14 }
 0x1cc   :  { %364 = shalt.err (!%p361_p4)
}
 0x1cd   :  { %s379_s4 = smov 128   ;;  %s380_s20 = smov 8  }
 0x1ce   :  { %271 = dma.vmem_to_hbm [thread:$0]  %s266_s18, 256, %s464_s5, [#allocation3], %s379_s4, %s379_s4, %s380_s20  }
 0x1cf   :  { %373 = dma.done.wait [#allocation3], 256  }
 0x1d0   :  { %374 = vsyncadd [#allocation3], 4294967040 }
 0x1d1   :  { %275 = vsyncpa [#allocation3], 1 }

</bundles_post_ra>
